<compile_context>
chip_gen: v6e
topology: v6e:2x2x1
jax: 0.10.0
libtpu: 0.0.40
codegen_flags: <defaults>
</compile_context>

<pallas_src>
import jax
import jax.numpy as jnp
from jax.experimental import pallas as pl
from jax.experimental.pallas import tpu as pltpu

FULL_ATOM_FEATURE_DIM0 = 119          # ogb get_atom_feature_dims()[0] (atomic number vocab)
_LANES = 128
_VMEM_STEP_BUDGET = 12 * 1024 * 1024  # keep per-step blocks under v5e's 16 MiB scoped default
_VMEM_LIMIT_BYTES = 32 * 1024 * 1024  # explicit scoped-VMEM limit (fits v5e/v6e/v7x)


# --------------------------------------------------------------------------------------
# Kernels
# --------------------------------------------------------------------------------------
def _packed_embedding_kernel(idx_ref, wpack_ref, out_ref):
    """Lane-packed gather: out[r, p*emb:(p+1)*emb] = table[idx[r, p], :].

    idx_ref:   (rows, P)            int32   row r holds nodes r*P .. r*P+P-1
    wpack_ref: (P, vocab_pad, 128)  float32 copy p of the table shifted to lanes [p*emb,(p+1)*emb)
    out_ref:   (rows, 128)          float32 lane-dense packed embeddings
    """
    rows = out_ref.shape[0]
    num_slots, vocab_pad, _ = wpack_ref.shape
    lane_iota = jax.lax.broadcasted_iota(jnp.int32, (rows, vocab_pad), 1)
    acc = None
    for p in range(num_slots):                       # static, small unrolled loop
        onehot = (idx_ref[:, p:p + 1] == lane_iota).astype(jnp.float32)
        term = jnp.dot(onehot, wpack_ref[p], preferred_element_type=jnp.float32)
        acc = term if acc is None else acc + term
    out_ref[...] = acc.astype(out_ref.dtype)


def _dense_embedding_kernel(idx_ref, table_ref, out_ref):
    """Natural-orientation gather for emb_dim % 128 == 0 (output already lane-dense)."""
    rows = out_ref.shape[0]
    vocab_pad = table_ref.shape[0]
    lane_iota = jax.lax.broadcasted_iota(jnp.int32, (rows, vocab_pad), 1)
    onehot = (idx_ref[...] == lane_iota).astype(jnp.float32)
    out_ref[...] = jnp.dot(onehot, table_ref[...],
                           preferred_element_type=jnp.float32).astype(out_ref.dtype)


# --------------------------------------------------------------------------------------
# Helpers
# --------------------------------------------------------------------------------------
def _round_up(v, m):
    return -(-v // m) * m


def _is_multi_tensorcore_chip():
    try:
        kind = jax.devices()[0].device_kind.lower()
    except Exception:
        return False
    return ("7x" in kind) or ("v7" in kind)        # v7x: 2 TensorCores / chip


def _dimension_semantics(num_steps, core_parallel):
    if core_parallel is None:
        core_parallel = _is_multi_tensorcore_chip() and num_steps >= 2
    if core_parallel and hasattr(pltpu, "CORE_PARALLEL"):
        return (pltpu.CORE_PARALLEL,)              # shard node-tile axis across v7x cores
    return ("parallel",)                           # near-no-op on 1-TC chips, harmless


def _choose_rows(total_rows, rows_target, per_row_bytes, resident_bytes):
    """Largest per-step row count that amortizes the ~0.35us grid-step overhead while
    keeping double-buffered blocks + intermediates inside the VMEM budget."""
    budget = max(_VMEM_STEP_BUDGET - resident_bytes, 1 << 20)
    cap = max(8, (budget // max(per_row_bytes, 1)) // 8 * 8)
    rows = max(8, min(rows_target, cap) // 8 * 8)
    if total_rows <= rows:
        return total_rows                          # single full-extent block
    return rows


# --------------------------------------------------------------------------------------
# Forward paths
# --------------------------------------------------------------------------------------
def _forward_packed(idx, wpack, emb_dim, n, tile_n, core_parallel):
    num_slots, vocab_pad, lanes = wpack.shape
    n_pad = _round_up(n, num_slots)
    if n_pad != n:
        idx = jnp.pad(idx, (0, n_pad - n))         # pad nodes gather row 0; sliced off below
    n_flat = n_pad // num_slots
    idx2d = idx.reshape(n_flat, num_slots)

    rows = _choose_rows(
        n_flat,
        max(1, tile_n // num_slots),
        per_row_bytes=2 * lanes * 4 + 2 * vocab_pad * 4 + 2 * num_slots * 4,
        resident_bytes=wpack.size * 4,
    )
    grid = (pl.cdiv(n_flat, rows),)

    out_flat = pl.pallas_call(
        _packed_embedding_kernel,
        out_shape=jax.ShapeDtypeStruct((n_flat, lanes), jnp.float32),
        grid_spec=pltpu.PrefetchScalarGridSpec(
            num_scalar_prefetch=0,
            grid=grid,
            in_specs=[
                pl.BlockSpec((rows, num_slots), lambda i: (i, 0)),                 # indices
                pl.BlockSpec((num_slots, vocab_pad, lanes), lambda i: (0, 0, 0)),  # resident tables
            ],
            out_specs=pl.BlockSpec((rows, lanes), lambda i: (i, 0)),               # lane-dense out
        ),
        compiler_params=pltpu.CompilerParams(
            dimension_semantics=_dimension_semantics(grid[0], core_parallel),
            allow_input_fusion=[True, False],
            vmem_limit_bytes=_VMEM_LIMIT_BYTES,
        ),
        cost_estimate=pl.CostEstimate(
            flops=2 * n_flat * num_slots * vocab_pad * lanes,
            transcendentals=0,
            bytes_accessed=idx2d.size * 4 + wpack.size * 4 + n_flat * lanes * 4,
        ),
    )(idx2d, wpack)

    out = out_flat.reshape(n_pad, emb_dim)         # metadata-only reshape
    if n_pad != n:
        out = out[:n]                              # only the ragged-N case pays a copy
    return out


def _forward_dense(idx, table_pad, n, tile_n, core_parallel):
    vocab_pad, emb_dim = table_pad.shape
    idx_col = idx.reshape(n, 1)

    rows = _choose_rows(
        n, tile_n,
        per_row_bytes=2 * emb_dim * 4 + 2 * vocab_pad * 4 + 8,
        resident_bytes=table_pad.size * 4,
    )
    grid = (pl.cdiv(n, rows),)

    return pl.pallas_call(
        _dense_embedding_kernel,
        out_shape=jax.ShapeDtypeStruct((n, emb_dim), jnp.float32),
        grid_spec=pltpu.PrefetchScalarGridSpec(
            num_scalar_prefetch=0,
            grid=grid,
            in_specs=[
                pl.BlockSpec((rows, 1), lambda i: (i, 0)),
                pl.BlockSpec((vocab_pad, emb_dim), lambda i: (0, 0)),
            ],
            out_specs=pl.BlockSpec((rows, emb_dim), lambda i: (i, 0)),
        ),
        compiler_params=pltpu.CompilerParams(
            dimension_semantics=_dimension_semantics(grid[0], core_parallel),
            allow_input_fusion=[True, False],
            vmem_limit_bytes=_VMEM_LIMIT_BYTES,
        ),
        cost_estimate=pl.CostEstimate(
            flops=2 * n * vocab_pad * emb_dim,
            transcendentals=0,
            bytes_accessed=n * 4 + table_pad.size * 4 + n * emb_dim * 4,
        ),
    )(idx_col, table_pad)


# --------------------------------------------------------------------------------------
# Public API
# --------------------------------------------------------------------------------------
def init_atom1_encoder(emb_dim, key):
    """Xavier-uniform init matching torch.nn.init.xavier_uniform_."""
    vocab = FULL_ATOM_FEATURE_DIM0
    bound = (6.0 / (vocab + emb_dim)) ** 0.5
    return jax.random.uniform(key, (vocab, emb_dim), jnp.float32, -bound, bound)


def pack_embedding_table(emb_table):
    """One-time (init-time) layout prep of the embedding table for the kernel."""
    vocab, emb_dim = emb_table.shape
    vocab_pad = _round_up(vocab, _LANES)
    emb_table = emb_table.astype(jnp.float32)
    if _LANES % emb_dim == 0:
        num_slots = _LANES // emb_dim              # nodes packed per 128-lane output row
        wpack = jnp.zeros((num_slots, vocab_pad, _LANES), jnp.float32)
        for p in range(num_slots):
            wpack = wpack.at[p, :vocab, p * emb_dim:(p + 1) * emb_dim].set(emb_table)
        return {"mode": "packed", "emb_dim": emb_dim, "wpack": wpack}
    if emb_dim % _LANES == 0:
        table_pad = jnp.zeros((vocab_pad, emb_dim), jnp.float32).at[:vocab].set(emb_table)
        return {"mode": "dense", "emb_dim": emb_dim, "table_pad": table_pad}
    # TODO(synk): no lane-dense packing for emb_dim that neither divides nor is a multiple
    # of 128 (e.g. 300); fall back to a plain XLA gather for those dims.
    return {"mode": "gather", "emb_dim": emb_dim, "table": emb_table}


def atom1_encoder_forward(x, packed, *, tile_n=8192, core_parallel=None):
    """x: (N, F) int atom features.  Returns (N, emb_dim) float32 == emb_table[x[:, 0]]."""
    idx = x[:, 0].astype(jnp.int32)
    n = x.shape[0]
    mode = packed["mode"]
    if mode == "packed":
        return _forward_packed(idx, packed["wpack"], packed["emb_dim"], n, tile_n, core_parallel)
    if mode == "dense":
        return _forward_dense(idx, packed["table_pad"], n, tile_n, core_parallel)
    return packed["table"][idx]


# --------------------------------------------------------------------------------------
# Self-test
# --------------------------------------------------------------------------------------
if __name__ == "__main__":
    key = jax.random.PRNGKey(0)
    k_t32, k_x1, k_x2, k_t256, k_x3, k_x4 = jax.random.split(key, 6)
    num_feats = 9  # OGB atom features per node

    # ---- packed path (emb_dim divides 128) ----
    emb_dim = 32
    table = init_atom1_encoder(emb_dim, k_t32)
    params = pack_embedding_table(table)

    # small ragged graph (N not a multiple of 128//emb_dim -> padded + sliced)
    x1 = jax.random.randint(k_x1, (10, num_feats), 0, FULL_ATOM_FEATURE_DIM0, dtype=jnp.int32)
    out1 = jax.block_until_ready(atom1_encoder_forward(x1, params))
    assert out1.shape == (10, emb_dim)
    assert jnp.allclose(out1, table[x1[:, 0]], atol=1e-5), "packed/ragged mismatch"

    # multi-step grid with a ragged last block (small tile_n just to force several steps)
    x2 = jax.random.randint(k_x2, (300, num_feats), 0, FULL_ATOM_FEATURE_DIM0, dtype=jnp.int32)
    out2 = jax.block_until_ready(atom1_encoder_forward(x2, params, tile_n=128))
    assert out2.shape == (300, emb_dim)
    assert jnp.allclose(out2, table[x2[:, 0]], atol=1e-5), "packed/multi-block mismatch"

    # ---- dense path (emb_dim multiple of 128) ----
    emb_dim_b = 256
    table_b = init_atom1_encoder(emb_dim_b, k_t256)
    params_b = pack_embedding_table(table_b)

    x3 = jax.random.randint(k_x3, (12, num_feats), 0, FULL_ATOM_FEATURE_DIM0, dtype=jnp.int32)
    out3 = jax.block_until_ready(atom1_encoder_forward(x3, params_b))
    assert out3.shape == (12, emb_dim_b)
    assert jnp.allclose(out3, table_b[x3[:, 0]], atol=1e-5), "dense/single-block mismatch"

    x4 = jax.random.randint(k_x4, (40, num_feats), 0, FULL_ATOM_FEATURE_DIM0, dtype=jnp.int32)
    out4 = jax.block_until_ready(atom1_encoder_forward(x4, params_b, tile_n=16))
    assert out4.shape == (40, emb_dim_b)
    assert jnp.allclose(out4, table_b[x4[:, 0]], atol=1e-5), "dense/multi-block mismatch"

    print("KERNEL_OK")
</pallas_src>

<mosaic_0001>
module attributes {stable_mosaic.version = 11 : i64} {
  func.func @_packed_embedding_kernel(%arg0: i32, %arg1: memref<3x4xi32, #tpu.memory_space<vmem>>, %arg2: memref<4x128x128xf32, #tpu.memory_space<vmem>>, %arg3: memref<3x128xf32, #tpu.memory_space<vmem>>) attributes {dimension_semantics = [#tpu.dimension_semantics<parallel>], iteration_bounds = array<i64: 1>, scalar_prefetch = 0 : i64, scratch_operands = 0 : i64, tpu.core_type = #tpu.core_type<tc>, window_params = [{transform_indices = @transform_0, window_bounds = array<i64: 3, 4>}, {pipeline_mode = #tpu.pipeline_mode<synchronous>, transform_indices = @transform_1, window_bounds = array<i64: 4, 128, 128>}, {transform_indices = @transform_2, window_bounds = array<i64: 3, 128>}]} {
    %0 = tpu.iota {dimensions = array<i32: 1>} : vector<3x128xi32>
    %c0 = arith.constant 0 : index
    %c0_0 = arith.constant 0 : index
    %1 = vector.load %arg1[%c0, %c0_0] : memref<3x4xi32, #tpu.memory_space<vmem>>, vector<3x1xi32>
    %2 = vector.broadcast %1 : vector<3x1xi32> to vector<3x128xi32>
    %3 = arith.cmpi eq, %2, %0 : vector<3x128xi32>
    %4 = arith.extui %3 : vector<3x128xi1> to vector<3x128xi32>
    %5 = arith.sitofp %4 : vector<3x128xi32> to vector<3x128xf32>
    %c0_1 = arith.constant 0 : index
    %c0_2 = arith.constant 0 : index
    %c0_3 = arith.constant 0 : index
    %6 = vector.load %arg2[%c0_1, %c0_2, %c0_3] : memref<4x128x128xf32, #tpu.memory_space<vmem>>, vector<1x128x128xf32>
    %7 = vector.shape_cast %6 : vector<1x128x128xf32> to vector<128x128xf32>
    %cst = arith.constant dense<0.000000e+00> : vector<3x128xf32>
    %8 = tpu.matmul %5, %7, %cst {dimension_numbers = #tpu.dot_dimension_numbers<[1], [0], [0], [1], [0, 0, 1, 1], [], []>} : vector<3x128xf32>, vector<128x128xf32>, vector<3x128xf32> -> vector<3x128xf32>
    %c0_4 = arith.constant 0 : index
    %c1 = arith.constant 1 : index
    %9 = vector.load %arg1[%c0_4, %c1] : memref<3x4xi32, #tpu.memory_space<vmem>>, vector<3x1xi32>
    %10 = vector.broadcast %9 : vector<3x1xi32> to vector<3x128xi32>
    %11 = arith.cmpi eq, %10, %0 : vector<3x128xi32>
    %12 = arith.extui %11 : vector<3x128xi1> to vector<3x128xi32>
    %13 = arith.sitofp %12 : vector<3x128xi32> to vector<3x128xf32>
    %c1_5 = arith.constant 1 : index
    %c0_6 = arith.constant 0 : index
    %c0_7 = arith.constant 0 : index
    %14 = vector.load %arg2[%c1_5, %c0_6, %c0_7] : memref<4x128x128xf32, #tpu.memory_space<vmem>>, vector<1x128x128xf32>
    %15 = vector.shape_cast %14 : vector<1x128x128xf32> to vector<128x128xf32>
    %cst_8 = arith.constant dense<0.000000e+00> : vector<3x128xf32>
    %16 = tpu.matmul %13, %15, %cst_8 {dimension_numbers = #tpu.dot_dimension_numbers<[1], [0], [0], [1], [0, 0, 1, 1], [], []>} : vector<3x128xf32>, vector<128x128xf32>, vector<3x128xf32> -> vector<3x128xf32>
    %17 = arith.addf %8, %16 : vector<3x128xf32>
    %c0_9 = arith.constant 0 : index
    %c2 = arith.constant 2 : index
    %18 = vector.load %arg1[%c0_9, %c2] : memref<3x4xi32, #tpu.memory_space<vmem>>, vector<3x1xi32>
    %19 = vector.broadcast %18 : vector<3x1xi32> to vector<3x128xi32>
    %20 = arith.cmpi eq, %19, %0 : vector<3x128xi32>
    %21 = arith.extui %20 : vector<3x128xi1> to vector<3x128xi32>
    %22 = arith.sitofp %21 : vector<3x128xi32> to vector<3x128xf32>
    %c2_10 = arith.constant 2 : index
    %c0_11 = arith.constant 0 : index
    %c0_12 = arith.constant 0 : index
    %23 = vector.load %arg2[%c2_10, %c0_11, %c0_12] : memref<4x128x128xf32, #tpu.memory_space<vmem>>, vector<1x128x128xf32>
    %24 = vector.shape_cast %23 : vector<1x128x128xf32> to vector<128x128xf32>
    %cst_13 = arith.constant dense<0.000000e+00> : vector<3x128xf32>
    %25 = tpu.matmul %22, %24, %cst_13 {dimension_numbers = #tpu.dot_dimension_numbers<[1], [0], [0], [1], [0, 0, 1, 1], [], []>} : vector<3x128xf32>, vector<128x128xf32>, vector<3x128xf32> -> vector<3x128xf32>
    %26 = arith.addf %17, %25 : vector<3x128xf32>
    %c0_14 = arith.constant 0 : index
    %c3 = arith.constant 3 : index
    %27 = vector.load %arg1[%c0_14, %c3] : memref<3x4xi32, #tpu.memory_space<vmem>>, vector<3x1xi32>
    %28 = vector.broadcast %27 : vector<3x1xi32> to vector<3x128xi32>
    %29 = arith.cmpi eq, %28, %0 : vector<3x128xi32>
    %30 = arith.extui %29 : vector<3x128xi1> to vector<3x128xi32>
    %31 = arith.sitofp %30 : vector<3x128xi32> to vector<3x128xf32>
    %c3_15 = arith.constant 3 : index
    %c0_16 = arith.constant 0 : index
    %c0_17 = arith.constant 0 : index
    %32 = vector.load %arg2[%c3_15, %c0_16, %c0_17] : memref<4x128x128xf32, #tpu.memory_space<vmem>>, vector<1x128x128xf32>
    %33 = vector.shape_cast %32 : vector<1x128x128xf32> to vector<128x128xf32>
    %cst_18 = arith.constant dense<0.000000e+00> : vector<3x128xf32>
    %34 = tpu.matmul %31, %33, %cst_18 {dimension_numbers = #tpu.dot_dimension_numbers<[1], [0], [0], [1], [0, 0, 1, 1], [], []>} : vector<3x128xf32>, vector<128x128xf32>, vector<3x128xf32> -> vector<3x128xf32>
    %35 = arith.addf %26, %34 : vector<3x128xf32>
    %c0_19 = arith.constant 0 : index
    %c0_20 = arith.constant 0 : index
    %36 = vector.load %arg3[%c0_19, %c0_20] : memref<3x128xf32, #tpu.memory_space<vmem>>, vector<3x128xf32>
    tpu.vector_store %arg3[%c0_19, %c0_20], %35 {strides = array<i32>} : memref<3x128xf32, #tpu.memory_space<vmem>>, vector<3x128xf32>,
    return
  }
  func.func @transform_0(%arg0: i32) -> (i32, i32) {
    %c0_i32 = arith.constant 0 : i32
    %c0_i32_0 = arith.constant 0 : i32
    return %arg0, %c0_i32 : i32, i32
  }
  func.func @transform_1(%arg0: i32) -> (i32, i32, i32) {
    %c0_i32 = arith.constant 0 : i32
    %c0_i32_0 = arith.constant 0 : i32
    %c0_i32_1 = arith.constant 0 : i32
    %c0_i32_2 = arith.constant 0 : i32
    return %c0_i32, %c0_i32_0, %c0_i32_1 : i32, i32, i32
  }
  func.func @transform_2(%arg0: i32) -> (i32, i32) {
    %c0_i32 = arith.constant 0 : i32
    %c0_i32_0 = arith.constant 0 : i32
    return %arg0, %c0_i32 : i32, i32
  }
}

</mosaic_0001>

<bundles_post_ra>
// kernel: tpu_custom_call.1
= control target key start
LH: loop header
LB: loop body
LE: loop exit
PB: predicated region body
PF: predicated region fallthrough
CT: control target
= control target key end

     0   :  { %7 = vsyncpa [#allocation3], 0  ;;  %s850_s0 = inlined_call_operand.hbm [shape: s32[3,4], index: 0, kind: input, shape index: {}]   ;;  %s851_s1 = inlined_call_operand.hbm [shape: f32[4,128,128], index: 1, kind: input, shape index: {}]   ;;  %s852_s2 = inlined_call_operand.hbm [shape: f32[3,128], index: 2, kind: output, shape index: {}]  }
   0x1   :  { %8 = vsyncpa [#allocation6], 0 }
   0x2   :  { %9 = vsyncpa [#allocation4], 0  ;;  %s730_s9 = smov [#allocation2]   ;;  %s731_s11 = smov [#allocation5]  }
   0x3   :  { %s16_s10 = sshll.u32 %s730_s9, 4  ;;  %s25_s12 = sshll.u32 %s731_s11, 4  ;;  %s17_s10 = int_to_ptr.vmem [resolvable:$true] %s16_s10  ;;  %s26_s12 = int_to_ptr.vmem [resolvable:$true] %s25_s12 }
   0x4   :  { %s672_s13 = scalar_lea.vmem %s17_s10, 64  ;;  %p677_p1 = scmp.lt.s32.totalorder %s17_s10, %s17_s10 }
   0x5   :  { %p673_p0 = scmp.ne.s32.totalorder %s17_s10, %s672_s13  ;;  %p678_p2 = scmp.lt.s32.totalorder %s672_s13, %s672_s13 }
   0x7   :  { %p679_p3 = por %p678_p2, %p677_p1 }
   0x9   :  { %p680_p4 = pnand %p679_p3, %p673_p0 }
   0xb   :  { %683 = shalt.err (!%p680_p4)
}
   0xc   :  { %19 = dma.hbm_to_vmem [thread:$0]  %s850_s0, 64, %s17_s10, [#allocation3]  }
   0xd   :  { %s692_s16 = scalar_lea.vmem %s26_s12, 8192  ;;  %p697_p6 = scmp.lt.s32.totalorder %s26_s12, %s26_s12 }
   0xe   :  { %p693_p5 = scmp.ne.s32.totalorder %s26_s12, %s692_s16  ;;  %p698_p7 = scmp.lt.s32.totalorder %s692_s16, %s692_s16 }
  0x10   :  { %p699_p8 = por %p698_p7, %p697_p6 }
  0x12   :  { %p700_p9 = pnand %p699_p8, %p693_p5 }
  0x14   :  { %703 = shalt.err (!%p700_p9)
}
  0x15   :  { %s732_s17 = smov 128   ;;  %s733_s18 = smov 8  }
  0x16   :  { %31 = dma.hbm_to_vmem [thread:$0]  %s851_s1, 8192, %s26_s12, [#allocation6], %s732_s17, %s732_s17, %s733_s18  }
  0x17   :  { %724 = dma.done.wait [#allocation3], 64  }
  0x18   :  { %725 = vsyncadd [#allocation3], 4294967232 }
  0x19   :  { %726 = dma.done.wait [#allocation6], 8192  }
  0x1a   :  { %727 = vsyncadd [#allocation6], 4294959104  ;;  %v734_v0 = vmov 1   ;;  %v735_v1 = vmov 2   ;;  %v736_v2 = vmov 0.0   ;;  %vm737_vm0 = vmmov 0  }
  0x1b   :  { %659 = vset.pattern.permute.xlu0 %v734_v0  ;;  %661 = vset.pattern.permute.xlu1 %v735_v1  ;;  %v40_v3 = vld [vmem:[#allocation2] sm:$0x7]  ;;  %v84_v5 = vld [vmem:[#allocation5 + $0xf0] sm:$0xff]  ;;  %v738_v8 = vmov 0   ;;  %v739_v9 = vmov 3   ;;  %v83_v10 = vld [vmem:[#allocation5 + $0xe8] sm:$0xff]  ;;  %v38_v38 = vlaneseq }
  0x1c   :  { %507 = vmatprep.subr.mxu0 %v736_v2  ;;  %542 = vmatprep.subr.mxu1 %v736_v2  ;;  %v85_v4 = vld [vmem:[#allocation5 + $0xf8] sm:$0xff]  ;;  %v61_v7 = vld [vmem:[#allocation5 + $0x70] sm:$0xff]  ;;  %v60_v11 = vld [vmem:[#allocation5 + $0x68] sm:$0xff]  ;;  %v740_v42 = vmov 1.0   ;;  %s741_s0 = smov [#allocation7]  }
  0x1d   :  { %539 = vmatprep.mubr.msk.f32.mxu0 %vm737_vm0, %v736_v2  ;;  %574 = vmatprep.mubr.msk.f32.mxu1 %vm737_vm0, %v736_v2  ;;  %v62_v6 = vld [vmem:[#allocation5 + $0x78] sm:$0xff]  ;;  %v82_v12 = vld [vmem:[#allocation5 + $0xe0] sm:$0xff]  ;;  %v80_v16 = vld [vmem:[#allocation5 + $0xd0] sm:$0xff]  ;;  %v803_v39 = vand.u32 127, %v38_v38  ;;  %s421_s1 = sshll.u32 %s741_s0, 4  ;;  %s422_s1 = int_to_ptr.vmem [resolvable:$true] %s421_s1 }
  0x1e   :  { %64 = vperm.xlu0 %659, %v40_v3   ;;  %227 = vperm.xlu1 %661, %v40_v3   ;;  %v59_v13 = vld [vmem:[#allocation5 + $0x60] sm:$0xff]  ;;  %v81_v14 = vld [vmem:[#allocation5 + $0xd8] sm:$0xff]  ;;  %v57_v17 = vld [vmem:[#allocation5 + $0x50] sm:$0xff]  ;;  %s704_s21 = scalar_lea.vmem %s422_s1, 64  ;;  %p709_p11 = scmp.lt.s32.totalorder %s422_s1, %s422_s1 }
  0x1f   :  { %508 = vmatpush3.msra.mxu0 %v85_v4  ;;  %543 = vmatpush3.msra.mxu1 %v62_v6  ;;  %v58_v15 = vld [vmem:[#allocation5 + $0x58] sm:$0xff]  ;;  %v79_v18 = vld [vmem:[#allocation5 + $0xc8] sm:$0xff]  ;;  %v78_v20 = vld [vmem:[#allocation5 + $0xc0] sm:$0xff]  ;;  %p705_p10 = scmp.ne.s32.totalorder %s422_s1, %s704_s21  ;;  %p710_p12 = scmp.lt.s32.totalorder %s704_s21, %s704_s21 }
  0x20   :  { %509 = vmatprep.subr.mxu0 %v736_v2  ;;  %544 = vmatprep.subr.mxu1 %v736_v2  ;;  %v56_v19 = vld [vmem:[#allocation5 + $0x48] sm:$0xff]  ;;  %v55_v21 = vld [vmem:[#allocation5 + $0x40] sm:$0xff]  ;;  %v77_v22 = vld [vmem:[#allocation5 + $0xb8] sm:$0xff] }
  0x21   :  { %510 = vmatpush3.msra.mxu0 %v84_v5  ;;  %545 = vmatpush3.msra.mxu1 %v61_v7  ;;  %v54_v23 = vld [vmem:[#allocation5 + $0x38] sm:$0xff]  ;;  %v76_v24 = vld [vmem:[#allocation5 + $0xb0] sm:$0xff]  ;;  %v75_v26 = vld [vmem:[#allocation5 + $0xa8] sm:$0xff]  ;;  %p711_p13 = por %p710_p12, %p709_p11 }
  0x22   :  { %660 = vset.pattern.permute.xlu0 %v738_v8  ;;  %662 = vset.pattern.permute.xlu1 %v739_v9  ;;  %v53_v25 = vld [vmem:[#allocation5 + $0x30] sm:$0xff]  ;;  %v52_v27 = vld [vmem:[#allocation5 + $0x28] sm:$0xff]  ;;  %v74_v28 = vld [vmem:[#allocation5 + $0xa0] sm:$0xff] }
  0x23   :  { %42 = vperm.xlu0 %660, %v40_v3   ;;  %321 = vperm.xlu1 %662, %v40_v3   ;;  %v51_v29 = vld [vmem:[#allocation5 + $0x20] sm:$0xff]  ;;  %v73_v30 = vld [vmem:[#allocation5 + $0x98] sm:$0xff]  ;;  %v72_v32 = vld [vmem:[#allocation5 + $0x90] sm:$0xff]  ;;  %p712_p0 = pnand %p711_p13, %p705_p10 }
  0x24   :  { %511 = vmatprep.subr.mxu0 %v736_v2  ;;  %546 = vmatprep.subr.mxu1 %v736_v2  ;;  %v50_v31 = vld [vmem:[#allocation5 + $0x18] sm:$0xff]  ;;  %v49_v33 = vld [vmem:[#allocation5 + $0x10] sm:$0xff]  ;;  %v71_v34 = vld [vmem:[#allocation5 + $0x88] sm:$0xff] }
  0x25   :  { %512 = vmatpush3.msra.mxu0 %v83_v10  ;;  %547 = vmatpush3.msra.mxu1 %v60_v11  ;;  %v48_v35 = vld [vmem:[#allocation5 + $0x8] sm:$0xff]  ;;  %v70_v36 = vld [vmem:[#allocation5 + $0x80] sm:$0xff]  ;;  %v248_v41 = vld [vmem:[#allocation5 + $0x178] sm:$0xff] }
  0x26   :  { %513 = vmatprep.subr.mxu0 %v736_v2  ;;  %548 = vmatprep.subr.mxu1 %v736_v2  ;;  %v47_v37 = vld [vmem:[#allocation5] sm:$0xff]  ;;  %v247_v43 = vld [vmem:[#allocation5 + $0x170] sm:$0xff]  ;;  %v246_v44 = vld [vmem:[#allocation5 + $0x168] sm:$0xff] }
  0x27   :  { %514 = vmatpush3.msra.mxu0 %v82_v12  ;;  %549 = vmatpush3.msra.mxu1 %v59_v13  ;;  %v342_v46 = vld [vmem:[#allocation5 + $0x1f8] sm:$0xff]  ;;  %v245_v47 = vld [vmem:[#allocation5 + $0x160] sm:$0xff]  ;;  %v341_v48 = vld [vmem:[#allocation5 + $0x1f0] sm:$0xff] }
  0x28   :  { %515 = vmatprep.subr.mxu0 %v736_v2  ;;  %550 = vmatprep.subr.mxu1 %v736_v2  ;;  %v244_v49 = vld [vmem:[#allocation5 + $0x158] sm:$0xff]  ;;  %v340_v50 = vld [vmem:[#allocation5 + $0x1e8] sm:$0xff]  ;;  %v243_v51 = vld [vmem:[#allocation5 + $0x150] sm:$0xff] }
  0x29   :  { %516 = vmatpush3.msra.mxu0 %v81_v14  ;;  %551 = vmatpush3.msra.mxu1 %v58_v15  ;;  %v339_v52 = vld [vmem:[#allocation5 + $0x1e0] sm:$0xff]  ;;  %v242_v53 = vld [vmem:[#allocation5 + $0x148] sm:$0xff]  ;;  %v338_v54 = vld [vmem:[#allocation5 + $0x1d8] sm:$0xff] }
  0x2a   :  { %517 = vmatprep.subr.mxu0 %v736_v2  ;;  %552 = vmatprep.subr.mxu1 %v736_v2  ;;  %v241_v55 = vld [vmem:[#allocation5 + $0x140] sm:$0xff]  ;;  %v337_v56 = vld [vmem:[#allocation5 + $0x1d0] sm:$0xff]  ;;  %v240_v57 = vld [vmem:[#allocation5 + $0x138] sm:$0xff] }
  0x2b   :  { %518 = vmatpush3.msra.mxu0 %v80_v16  ;;  %553 = vmatpush3.msra.mxu1 %v57_v17  ;;  %v336_v58 = vld [vmem:[#allocation5 + $0x1c8] sm:$0xff]  ;;  %v239_v59 = vld [vmem:[#allocation5 + $0x130] sm:$0xff]  ;;  %v335_v60 = vld [vmem:[#allocation5 + $0x1c0] sm:$0xff] }
  0x2c   :  { %519 = vmatprep.subr.mxu0 %v736_v2  ;;  %554 = vmatprep.subr.mxu1 %v736_v2  ;;  %v238_v61 = vld [vmem:[#allocation5 + $0x128] sm:$0xff]  ;;  %v334_v62 = vld [vmem:[#allocation5 + $0x1b8] sm:$0xff]  ;;  %v237_v63 = vld [vmem:[#allocation5 + $0x120] sm:$0xff] }
  0x2d   :  { %520 = vmatpush3.msra.mxu0 %v79_v18  ;;  %555 = vmatpush3.msra.mxu1 %v56_v19  ;;  %v333_v0 = vld [vmem:[#allocation5 + $0x1b0] sm:$0xff]  ;;  %v236_v1 = vld [vmem:[#allocation5 + $0x118] sm:$0xff]  ;;  %v332_v3 = vld [vmem:[#allocation5 + $0x1a8] sm:$0xff] }
  0x2e   :  { %521 = vmatprep.subr.mxu0 %v736_v2  ;;  %556 = vmatprep.subr.mxu1 %v736_v2  ;;  %v235_v4 = vld [vmem:[#allocation5 + $0x110] sm:$0xff]  ;;  %v331_v5 = vld [vmem:[#allocation5 + $0x1a0] sm:$0xff]  ;;  %v234_v7 = vld [vmem:[#allocation5 + $0x108] sm:$0xff] }
  0x2f   :  { %522 = vmatpush3.msra.mxu0 %v78_v20  ;;  %557 = vmatpush3.msra.mxu1 %v55_v21  ;;  %v330_v8 = vld [vmem:[#allocation5 + $0x198] sm:$0xff]  ;;  %v329_v10 = vld [vmem:[#allocation5 + $0x190] sm:$0xff]  ;;  %v328_v11 = vld [vmem:[#allocation5 + $0x188] sm:$0xff] }
  0x30   :  { %523 = vmatprep.subr.mxu0 %v736_v2  ;;  %558 = vmatprep.subr.mxu1 %v736_v2  ;;  %v327_v13 = vld [vmem:[#allocation5 + $0x180] sm:$0xff] }
  0x31   :  { %524 = vmatpush3.msra.mxu0 %v77_v22  ;;  %559 = vmatpush3.msra.mxu1 %v54_v23 }
  0x32   :  { %525 = vmatprep.subr.mxu0 %v736_v2  ;;  %560 = vmatprep.subr.mxu1 %v736_v2 }
  0x33   :  { %526 = vmatpush3.msra.mxu0 %v76_v24  ;;  %561 = vmatpush3.msra.mxu1 %v53_v25 }
  0x34   :  { %527 = vmatprep.subr.mxu0 %v736_v2  ;;  %562 = vmatprep.subr.mxu1 %v736_v2 }
  0x35   :  { %528 = vmatpush3.msra.mxu0 %v75_v26  ;;  %563 = vmatpush3.msra.mxu1 %v52_v27 }
  0x36   :  { %529 = vmatprep.subr.mxu0 %v736_v2  ;;  %564 = vmatprep.subr.mxu1 %v736_v2 }
  0x37   :  { %530 = vmatpush3.msra.mxu0 %v74_v28  ;;  %565 = vmatpush3.msra.mxu1 %v51_v29 }
  0x38   :  { %531 = vmatprep.subr.mxu0 %v736_v2  ;;  %566 = vmatprep.subr.mxu1 %v736_v2 }
  0x39   :  { %532 = vmatpush3.msra.mxu0 %v73_v30  ;;  %567 = vmatpush3.msra.mxu1 %v50_v31 }
  0x3a   :  { %533 = vmatprep.subr.mxu0 %v736_v2  ;;  %568 = vmatprep.subr.mxu1 %v736_v2 }
  0x3b   :  { %534 = vmatpush3.msra.mxu0 %v72_v32  ;;  %569 = vmatpush3.msra.mxu1 %v49_v33 }
  0x3c   :  { %535 = vmatprep.subr.mxu0 %v736_v2  ;;  %570 = vmatprep.subr.mxu1 %v736_v2 }
  0x3d   :  { %536 = vmatpush3.msra.mxu0 %v71_v34  ;;  %571 = vmatpush3.msra.mxu1 %v48_v35 }
  0x3e   :  { %537 = vmatprep.subr.mxu0 %v736_v2  ;;  %572 = vmatprep.subr.mxu1 %v736_v2 }
  0x3f   :  { %538 = vmatpush3.msra.mxu0 %v70_v36  ;;  %573 = vmatpush3.msra.mxu1 %v47_v37 }
  0x40   :  { %577 = vmatprep.subr.mxu0 %v736_v2  ;;  %612 = vmatprep.subr.mxu1 %v736_v2 }
  0x41   :  { %663 = vset.pattern.permute.xlu0 %v739_v9  ;;  %v233_v9 = vld [vmem:[#allocation5 + $0x100] sm:$0xff] }
  0x99   :  { %v65_v40 = vpop.permute.xlu0 %64  ;;  %v228_v6 = vpop.permute.xlu1 %227 }
  0x9a   :  { %vm66_vm1 = vcmp.eq.s32.totalorder %v65_v40, %v803_v39  ;;  %vm229_vm3 = vcmp.eq.s32.totalorder %v228_v6, %v803_v39 }
  0x9b   :  { %540 = vmatmul.mubr.msk.f32.vlgmr.msra.gmra.mxu0 %vm66_vm1, %v740_v42 }
  0x9c   :  { %578 = vmatpush3.msra.mxu0 %v248_v41  ;;  %609 = vmatprep.mubr.msk.f32.mxu0 %vm737_vm0, %v736_v2 }
  0x9d   :  { %579 = vmatprep.subr.mxu0 %v736_v2 }
  0x9e   :  { %580 = vmatpush3.msra.mxu0 %v247_v43  ;;  %v43_v45 = vpop.permute.xlu0 %42  ;;  %v322_v12 = vpop.permute.xlu1 %321 }
  0x9f   :  { %581 = vmatprep.subr.mxu0 %v736_v2  ;;  %vm44_vm2 = vcmp.eq.s32.totalorder %v43_v45, %v803_v39  ;;  %vm323_vm4 = vcmp.eq.s32.totalorder %v322_v12, %v803_v39 }
  0xa0   :  { %582 = vmatpush3.msra.mxu0 %v246_v44  ;;  %575 = vmatmul.mubr.msk.f32.vlgmr.msra.gmra.mxu1 %vm44_vm2, %v740_v42 }
  0xa1   :  { %583 = vmatprep.subr.mxu0 %v736_v2  ;;  %613 = vmatpush3.msra.mxu1 %v342_v46 }
  0xa2   :  { %584 = vmatpush3.msra.mxu0 %v245_v47  ;;  %614 = vmatprep.subr.mxu1 %v736_v2 }
  0xa3   :  { %585 = vmatprep.subr.mxu0 %v736_v2  ;;  %615 = vmatpush3.msra.mxu1 %v341_v48 }
  0xa4   :  { %586 = vmatpush3.msra.mxu0 %v244_v49  ;;  %616 = vmatprep.subr.mxu1 %v736_v2 }
  0xa5   :  { %587 = vmatprep.subr.mxu0 %v736_v2  ;;  %617 = vmatpush3.msra.mxu1 %v340_v50 }
  0xa6   :  { %588 = vmatpush3.msra.mxu0 %v243_v51  ;;  %618 = vmatprep.subr.mxu1 %v736_v2 }
  0xa7   :  { %589 = vmatprep.subr.mxu0 %v736_v2  ;;  %619 = vmatpush3.msra.mxu1 %v339_v52 }
  0xa8   :  { %590 = vmatpush3.msra.mxu0 %v242_v53  ;;  %620 = vmatprep.subr.mxu1 %v736_v2 }
  0xa9   :  { %591 = vmatprep.subr.mxu0 %v736_v2  ;;  %621 = vmatpush3.msra.mxu1 %v338_v54 }
  0xaa   :  { %592 = vmatpush3.msra.mxu0 %v241_v55  ;;  %622 = vmatprep.subr.mxu1 %v736_v2 }
  0xab   :  { %593 = vmatprep.subr.mxu0 %v736_v2  ;;  %623 = vmatpush3.msra.mxu1 %v337_v56 }
  0xac   :  { %594 = vmatpush3.msra.mxu0 %v240_v57  ;;  %624 = vmatprep.subr.mxu1 %v736_v2 }
  0xad   :  { %595 = vmatprep.subr.mxu0 %v736_v2  ;;  %625 = vmatpush3.msra.mxu1 %v336_v58 }
  0xae   :  { %596 = vmatpush3.msra.mxu0 %v239_v59  ;;  %626 = vmatprep.subr.mxu1 %v736_v2 }
  0xaf   :  { %597 = vmatprep.subr.mxu0 %v736_v2  ;;  %627 = vmatpush3.msra.mxu1 %v335_v60 }
  0xb0   :  { %598 = vmatpush3.msra.mxu0 %v238_v61  ;;  %628 = vmatprep.subr.mxu1 %v736_v2 }
  0xb1   :  { %599 = vmatprep.subr.mxu0 %v736_v2  ;;  %629 = vmatpush3.msra.mxu1 %v334_v62 }
  0xb2   :  { %600 = vmatpush3.msra.mxu0 %v237_v63  ;;  %630 = vmatprep.subr.mxu1 %v736_v2 }
  0xb3   :  { %601 = vmatprep.subr.mxu0 %v736_v2  ;;  %631 = vmatpush3.msra.mxu1 %v333_v0 }
  0xb4   :  { %602 = vmatpush3.msra.mxu0 %v236_v1  ;;  %632 = vmatprep.subr.mxu1 %v736_v2 }
  0xb5   :  { %603 = vmatprep.subr.mxu0 %v736_v2  ;;  %633 = vmatpush3.msra.mxu1 %v332_v3 }
  0xb6   :  { %604 = vmatpush3.msra.mxu0 %v235_v4  ;;  %634 = vmatprep.subr.mxu1 %v736_v2 }
  0xb7   :  { %605 = vmatprep.subr.mxu0 %v736_v2  ;;  %635 = vmatpush3.msra.mxu1 %v331_v5 }
  0xb8   :  { %606 = vmatpush3.msra.mxu0 %v234_v7  ;;  %636 = vmatprep.subr.mxu1 %v736_v2 }
  0xb9   :  { %607 = vmatprep.subr.mxu0 %v736_v2  ;;  %637 = vmatpush3.msra.mxu1 %v330_v8 }
  0xba   :  { %608 = vmatpush3.msra.mxu0 %v233_v9  ;;  %638 = vmatprep.subr.mxu1 %v736_v2 }
  0xbb   :  { %610 = vmatmul.mubr.msk.f32.vlgmr.msra.gmra.mxu0 %vm229_vm3, %v740_v42  ;;  %639 = vmatpush3.msra.mxu1 %v329_v10 }
  0xbc   :  { %640 = vmatprep.subr.mxu1 %v736_v2  ;;  %644 = vmatprep.mubr.msk.f32.mxu1 %vm737_vm0, %v736_v2 }
  0xbd   :  { %641 = vmatpush3.msra.mxu1 %v328_v11 }
  0xbe   :  { %642 = vmatprep.subr.mxu1 %v736_v2 }
  0xbf   :  { %643 = vmatpush3.msra.mxu1 %v327_v13 }
  0xc0   :  { %645 = vmatmul.mubr.msk.f32.vlgmr.msra.gmra.mxu1 %vm323_vm4, %v740_v42 }
 0x15b   :  { %v152_v14 = vpop.f32.mrf.mxu0 }
 0x15d   :  { %v541_v15 = vpop.f32.mrf.mxu0 }
 0x160   :  { %v222_v16 = vpop.f32.mrf.mxu1 }
 0x161   :  { %v223_v19 = vadd.f32 %v222_v16, %v152_v14 }
 0x162   :  { %v576_v17 = vpop.f32.mrf.mxu1 }
 0x17b   :  { %v315_v18 = vpop.f32.mrf.mxu0 }
 0x17c   :  { %v319_v21 = vadd.f32 %v315_v18, %v223_v19 }
 0x17d   :  { %v611_v20 = vpop.f32.mrf.mxu0 }
 0x180   :  { %v409_v22 = vpop.f32.mrf.mxu1 }
 0x181   :  { %v413_v23 = vadd.f32 %v409_v22, %v319_v21 }
 0x182   :  { %v646_v24 = vpop.f32.mrf.mxu1 }
 0x183   :  { %414 = vst [vmem:[#allocation7] sm:$0x7] %v413_v23 }
 0x184   :  { %715 = shalt.err (!%p712_p0)
}
 0x185   :  { %424 = dma.vmem_to_hbm [thread:$0]  %s422_s1, 64, %s852_s2, [#allocation4]  }
 0x186   :  { %728 = dma.done.wait [#allocation4], 64  }
 0x187   :  { %729 = vsyncadd [#allocation4], 4294967232 }
 0x188   :  { %428 = vsyncpa [#allocation3], 1 }
 0x189   :  { %429 = vsyncpa [#allocation6], 1 }
 0x18a   :  { %430 = vsyncpa [#allocation4], 1 }

</bundles_post_ra>
